<compile_context>
chip_gen: v7x
topology: tpu7x:2x2x1
jax: 0.10.0
libtpu: 0.0.40
codegen_flags: <defaults>
</compile_context>

<pallas_src>
import jax
import jax.numpy as jnp
from jax.experimental import pallas as pl
from jax.experimental.pallas import tpu as pltpu


def linear_kernel(x_ref, wt_ref, b_ref, o_ref):
    """x_ref: (B, in_f) VMEM; wt_ref: (in_f, out_f) VMEM; b_ref: (1, out_f) VMEM;
    o_ref: (B, out_f) VMEM.

    Pure-VPU broadcast accumulation: (B,1) * (1,out_f) -> (B,out_f), summed
    over the K=in_f columns (unrolled at trace time), plus a lane-broadcast
    bias add.  Single unmasked full-tile store at the end.
    """
    in_f = wt_ref.shape[0]

    y = x_ref[:, 0:1] * wt_ref[0:1, :]
    for k in range(1, in_f):                    # in_f = 2, unrolled at trace time
        y = y + x_ref[:, k:k + 1] * wt_ref[k:k + 1, :]
    y = y + b_ref[...]                          # (1, out_f) sublane-broadcast
    o_ref[...] = y.astype(o_ref.dtype)


def linear_pallas(x, weight, bias):
    """PyTorch nn.Linear semantics: y = x @ weight.T + bias.

    x:      (B, in_features)            float32
    weight: (out_features, in_features) float32  (PyTorch layout)
    bias:   (out_features,)             float32
    """
    B, in_f = x.shape
    out_f = weight.shape[0]

    # One-time, constant-foldable layout changes (not compute hoisting).
    wt = weight.T                     # (in_f, out_f)
    b2 = bias.reshape(1, out_f)       # (1, out_f)

    flops = 2 * B * in_f * out_f
    bytes_accessed = 4 * (B * in_f + in_f * out_f + out_f + B * out_f)

    return pl.pallas_call(
        linear_kernel,
        out_shape=jax.ShapeDtypeStruct((B, out_f), x.dtype),
        in_specs=[
            pl.BlockSpec(memory_space=pltpu.MemorySpace.VMEM),   # x
            pl.BlockSpec(memory_space=pltpu.MemorySpace.VMEM),   # weight^T
            pl.BlockSpec(memory_space=pltpu.MemorySpace.VMEM),   # bias (1, out_f)
        ],
        out_specs=pl.BlockSpec(memory_space=pltpu.MemorySpace.VMEM),
        cost_estimate=pl.CostEstimate(
            flops=flops, transcendentals=0, bytes_accessed=bytes_accessed
        ),
    )(x, wt, b2)


if __name__ == "__main__":
    key = jax.random.PRNGKey(0)
    k_x, k_w, k_b = jax.random.split(key, 3)

    B, in_features, out_features = 8, 2, 3

    # Deterministic synthetic parameters (nn.Linear(2, 3) shapes, PyTorch layout).
    weight = jax.random.uniform(
        k_w, (out_features, in_features), jnp.float32, minval=-0.5, maxval=0.5
    )
    bias = jax.random.uniform(
        k_b, (out_features,), jnp.float32, minval=-0.5, maxval=0.5
    )
    x = jax.random.normal(k_x, (B, in_features), jnp.float32)

    y = linear_pallas(x, weight, bias)
    jax.block_until_ready(y)

    # Reference check against plain JAX.
    y_ref = x @ weight.T + bias
    assert y.shape == (B, out_features)
    assert jnp.allclose(y, y_ref, atol=1e-5, rtol=1e-5)

    print("KERNEL_OK")
</pallas_src>

<mosaic_0001>
module attributes {stable_mosaic.version = 11 : i64} {
  func.func @linear_kernel(%arg0: memref<8x2xf32, #tpu.memory_space<vmem>>, %arg1: memref<2x3xf32, #tpu.memory_space<vmem>>, %arg2: memref<1x3xf32, #tpu.memory_space<vmem>>, %arg3: memref<8x3xf32, #tpu.memory_space<vmem>>) attributes {dimension_semantics = [], scalar_prefetch = 0 : i64, scratch_operands = 0 : i64, tpu.core_type = #tpu.core_type<tc>} {
    %c0 = arith.constant 0 : index
    %c0_0 = arith.constant 0 : index
    %0 = vector.load %arg0[%c0, %c0_0] : memref<8x2xf32, #tpu.memory_space<vmem>>, vector<8x1xf32>
    %c0_1 = arith.constant 0 : index
    %c0_2 = arith.constant 0 : index
    %1 = vector.load %arg1[%c0_1, %c0_2] : memref<2x3xf32, #tpu.memory_space<vmem>>, vector<1x3xf32>
    %2 = vector.broadcast %0 : vector<8x1xf32> to vector<8x3xf32>
    %3 = vector.broadcast %1 : vector<1x3xf32> to vector<8x3xf32>
    %4 = arith.mulf %2, %3 : vector<8x3xf32>
    %c0_3 = arith.constant 0 : index
    %c1 = arith.constant 1 : index
    %5 = vector.load %arg0[%c0_3, %c1] : memref<8x2xf32, #tpu.memory_space<vmem>>, vector<8x1xf32>
    %c1_4 = arith.constant 1 : index
    %c0_5 = arith.constant 0 : index
    %6 = vector.load %arg1[%c1_4, %c0_5] : memref<2x3xf32, #tpu.memory_space<vmem>>, vector<1x3xf32>
    %7 = vector.broadcast %5 : vector<8x1xf32> to vector<8x3xf32>
    %8 = vector.broadcast %6 : vector<1x3xf32> to vector<8x3xf32>
    %9 = arith.mulf %7, %8 : vector<8x3xf32>
    %10 = arith.addf %4, %9 : vector<8x3xf32>
    %c0_6 = arith.constant 0 : index
    %c0_7 = arith.constant 0 : index
    %11 = vector.load %arg2[%c0_6, %c0_7] : memref<1x3xf32, #tpu.memory_space<vmem>>, vector<1x3xf32>
    %12 = vector.broadcast %11 : vector<1x3xf32> to vector<8x3xf32>
    %13 = arith.addf %10, %12 : vector<8x3xf32>
    %c0_8 = arith.constant 0 : index
    %c0_9 = arith.constant 0 : index
    %14 = vector.load %arg3[%c0_8, %c0_9] : memref<8x3xf32, #tpu.memory_space<vmem>>, vector<8x3xf32>
    tpu.vector_store %arg3[%c0_8, %c0_9], %13 {strides = array<i32>} : memref<8x3xf32, #tpu.memory_space<vmem>>, vector<8x3xf32>,
    return
  }
}

</mosaic_0001>

<bundles_post_ra>
// kernel: tpu_custom_call.1
= control target key start
LH: loop header
LB: loop body
LE: loop exit
PB: predicated region body
PF: predicated region fallthrough
CT: control target
= control target key end

     0   :  { %v58_v0 = vmov 0   ;;  %v59_v2 = vmov 1   ;;  %vm45_vm0 = vcmask 23552   ;;  %s95_s0 = inlined_call_operand.vmem [shape: f32[8,2], index: 0, kind: input, shape index: {}]   ;;  %s96_s1 = inlined_call_operand.vmem [shape: f32[2,3], index: 1, kind: input, shape index: {}]   ;;  %s97_s2 = inlined_call_operand.vmem [shape: f32[1,3], index: 2, kind: input, shape index: {}]   ;;  %s98_s3 = inlined_call_operand.vmem [shape: f32[8,3], index: 3, kind: output, shape index: {}]  }
   0x1   :  { %56 = vset.pattern.permute.xlu0 %v58_v0  ;;  %v14_v1 = vld [vmem:[%s95_s0] sm:$0xff] }
   0x2   :  { %18 = vperm.xlu0 %56, %v14_v1   ;;  %v51_v4 = vld [vmem:[%s96_s1] ss:$0 sm:$0xff]  ;;  %v52_v5 = vld [vmem:[%s96_s1 + $0x1] ss:$0 sm:$0xff] }
   0x3   :  { %v53_v9 = vld [vmem:[%s97_s2] ss:$0 sm:$0xff] }
   0x6   :  { %57 = vset.pattern.permute.xlu0 %v59_v2 }
   0x7   :  { %28 = vperm.xlu0 %57, %v14_v1  }
  0x81   :  { %v19_v3 = vpop.permute.xlu0 %18 }
  0x82   :  { %v25_v7 = vmul.f32 %v51_v4, %v19_v3 }
  0x86   :  { %v29_v6 = vpop.permute.xlu0 %28 }
  0x87   :  { %v35_v8 = vmul.f32 %v52_v5, %v29_v6 }
  0x89   :  { %v36_v10 = vadd.f32 %v35_v8, %v25_v7 }
  0x8b   :  { %v44_v11 = vadd.f32 %v53_v9, %v36_v10 }
  0x8d   :  { %46 = vst.msk [vmem:[%s98_s3] sm:$0xff] %vm45_vm0, %v44_v11 }

</bundles_post_ra>
